<compile_context>
chip_gen: v7x
topology: tpu7x:2x2x1
jax: 0.10.0
libtpu: 0.0.40
codegen_flags: <defaults>
</compile_context>

<pallas_src>
import functools

import jax
import jax.numpy as jnp
from jax.experimental import pallas as pl
from jax.experimental.pallas import tpu as pltpu


def _round_up(v, m):
    return (v + m - 1) // m * m


def _normed_linear_kernel(*refs, activation: str, simnorm_dim: int, eps: float,
                          out_features: int, n_pad: int, mxu_dtype, k_tiled: bool):
    if activation == "SimNorm":
        if k_tiled:
            x_ref, w_ref, g_ref, b_ref, ones_ref, o_ref, acc_ref = refs
        else:
            x_ref, w_ref, g_ref, b_ref, ones_ref, o_ref = refs
            acc_ref = None
    else:
        if k_tiled:
            x_ref, w_ref, g_ref, b_ref, o_ref, acc_ref = refs
        else:
            x_ref, w_ref, g_ref, b_ref, o_ref = refs
            acc_ref = None
        ones_ref = None

    # Step 01: Linear (no bias). x cast to bf16 on the VPU; f32 accumulation on MXU.
    partial = jnp.dot(x_ref[...].astype(mxu_dtype), w_ref[...],
                      preferred_element_type=jnp.float32)

    def epilogue(y):
        # Step 02: Dropout -- p=0.0 / eval mode => identity.

        # Step 03: LayerNorm over the REAL out_features.  Padded columns of y are
        # exact zeros (padded weight cols are zero), so the mean sum is exact; the
        # centered values in padded lanes are masked before the variance sum
        # (two-pass variance, robust against E[x^2]-E[x]^2 cancellation).
        inv_n = 1.0 / out_features
        mean = jnp.sum(y, axis=-1, keepdims=True) * inv_n
        yc = y - mean
        if n_pad != out_features:
            lane = jax.lax.broadcasted_iota(jnp.int32, y.shape, 1)
            yc = jnp.where(lane < out_features, yc, 0.0)
        var = jnp.sum(yc * yc, axis=-1, keepdims=True) * inv_n
        z = yc * jax.lax.rsqrt(var + eps)
        z = z * g_ref[...] + b_ref[...]          # padded cols -> 0 (gamma=beta=0 there)

        # Step 04: Activation.
        if activation == "Mish":
            # mish(x) = x*tanh(softplus(x)) = x*(t^2+2t)/(t^2+2t+2), t=exp(x).
            # One EUP exp + one approx reciprocal; clamp before exp to avoid overflow,
            # mish(x) ~= x for x > 20.
            t = jnp.exp(jnp.minimum(z, 20.0))
            u = t * (t + 2.0)
            mish = z * u * pl.reciprocal(u + 2.0, approx=True)
            z = jnp.where(z > 20.0, z, mish)
        else:  # SimNorm: softmax over contiguous lane-aligned groups of size d.
            d = simnorm_dim
            n = z.shape[-1]
            lane = jax.lax.broadcasted_iota(jnp.int32, z.shape, 1)
            # Per-group max via a log2(d) hypercube butterfly (XLU rolls, lane-dense).
            gmax = z
            s = 1
            while s < d:
                up = pltpu.roll(gmax, n - s, 1)   # value from lane i + s
                dn = pltpu.roll(gmax, s, 1)       # value from lane i - s
                gmax = jnp.maximum(gmax, jnp.where((lane & s) == 0, up, dn))
                s *= 2
            e = jnp.exp(z - gmax)
            # Per-group sum on the (otherwise idle) MXU via a constant block-diagonal
            # ones matrix -- halves the XLU/select work vs. a second butterfly.
            gsum = jnp.dot(e.astype(ones_ref.dtype), ones_ref[...],
                           preferred_element_type=jnp.float32)
            z = e * pl.reciprocal(gsum, approx=True)

        o_ref[...] = z.astype(o_ref.dtype)

    if not k_tiled:
        # Single K step: no accumulator scratch, no extra VMEM round trip.
        epilogue(partial)
    else:
        k = pl.program_id(1)

        @pl.when(k == 0)
        def _():
            acc_ref[...] = partial               # init by assignment, not zero+add

        @pl.when(k > 0)
        def _():
            acc_ref[...] += partial

        @pl.when(k == pl.num_programs(1) - 1)
        def _():
            epilogue(acc_ref[...])


def normed_linear(x, weight, gamma, beta, *, activation: str, simnorm_dim: int = 8,
                  eps: float = 1e-5, row_tile: int = 256, k_tile: int = 512,
                  mxu_dtype=jnp.bfloat16, out_dtype=None):
    """x: (..., in_features); weight: (out_features, in_features) as in PyTorch."""
    assert activation in ("Mish", "SimNorm"), f"Activation {activation} not implemented."
    orig_shape = x.shape
    K = orig_shape[-1]
    N = weight.shape[0]
    assert weight.shape == (N, K)
    if activation == "SimNorm":
        assert N % simnorm_dim == 0
        assert simnorm_dim & (simnorm_dim - 1) == 0 and simnorm_dim <= 128, \
            "simnorm_dim must be a power of 2 (<=128)"

    # bf16 output (out_dtype=jnp.bfloat16) halves HBM writeback on v5e if tolerated.
    out_dtype = x.dtype if out_dtype is None else out_dtype
    x2d = x.reshape(-1, K)
    rows = x2d.shape[0]
    n_pad = _round_up(N, 128)                    # lane-dense output width

    MB = 1024 * 1024
    try:
        vmem_cap = int(pltpu.get_tpu_info().vmem_capacity_bytes)
    except Exception:
        vmem_cap = 64 * MB                       # conservative (v7x-sized) fallback
    if vmem_cap >= 100 * MB:                     # v5e / v6e: 128 MiB physical VMEM
        ws_budget, vmem_limit = 48 * MB, 96 * MB
    else:                                        # v7x: 64 MiB per TensorCore
        ws_budget, vmem_limit = 22 * MB, 48 * MB

    xb = jnp.dtype(x.dtype).itemsize
    wb = jnp.dtype(mxu_dtype).itemsize
    ob = jnp.dtype(out_dtype).itemsize
    ones_bytes = (2 * n_pad * n_pad * wb) if activation == "SimNorm" else 0

    # Balanced row tiles (minimize padding waste), sublane-rounded.  Note: for large
    # row counts row_tile=256 keeps tiles MXU-aligned on v6e/v7x.
    n_tiles = max(1, pl.cdiv(rows, row_tile))
    # v7x has 2 TensorCores sharing the "parallel" axis: make sure it has >= 2 tiles.
    if vmem_cap < 100 * MB and n_tiles == 1 and rows >= 16:
        n_tiles = 2
    tm = max(8, _round_up(pl.cdiv(rows, n_tiles), 8))

    def ws_single(tm_):   # double-buffered blocks + f32 epilogue temporaries
        return (2 * tm_ * K * xb + 2 * K * n_pad * wb + 2 * 2 * n_pad * 4
                + ones_bytes + 2 * tm_ * n_pad * ob + 5 * tm_ * n_pad * 4)

    def ws_ktiled(tm_, tk_):
        return (2 * tm_ * tk_ * xb + 2 * tk_ * n_pad * wb + 2 * 2 * n_pad * 4
                + ones_bytes + 2 * tm_ * n_pad * ob + 6 * tm_ * n_pad * 4)

    # Prefer the single-K path (weight streamed from HBM exactly once).
    tm_s = tm
    while tm_s > 8 and ws_single(tm_s) > ws_budget:
        tm_s = max(8, _round_up(tm_s // 2, 8))
    k_tiled = ws_single(tm_s) > ws_budget

    if not k_tiled:
        tm = tm_s
        tk = K
        k_pad = K
    else:
        # Fallback: tile K (weight cannot be VMEM-resident anyway).
        # TODO(synk): persistent weight staging via memory_space=pl.ANY +
        # pltpu.make_async_copy to avoid re-streaming it once per row tile.
        tk = min(k_tile, _round_up(K, 128))
        k_pad = _round_up(K, tk)
        while tm > 8 and ws_ktiled(tm, tk) > ws_budget:
            tm = max(8, _round_up(tm // 2, 8))

    rows_pad = _round_up(rows, tm)
    grid0 = rows_pad // tm

    # Pad only when needed (each wrapper pad is an extra HBM pass).  x keeps its
    # native dtype; the cast to bf16 happens inside the kernel.
    if rows_pad != rows or k_pad != K:
        x2d = jnp.pad(x2d, ((0, rows_pad - rows), (0, k_pad - K)))
    wt = weight.T
    if k_pad != K or n_pad != N:
        wt = jnp.pad(wt, ((0, k_pad - K), (0, n_pad - N)))
    wt = wt.astype(mxu_dtype)
    gamma_p = jnp.pad(gamma.astype(jnp.float32), (0, n_pad - N)).reshape(1, n_pad)
    beta_p = jnp.pad(beta.astype(jnp.float32), (0, n_pad - N)).reshape(1, n_pad)

    operands = [x2d, wt, gamma_p, beta_p]
    if activation == "SimNorm":
        gidx = jnp.arange(n_pad, dtype=jnp.int32) // simnorm_dim
        ones_bd = (gidx[:, None] == gidx[None, :]).astype(mxu_dtype)
        operands.append(ones_bd)

    if not k_tiled:
        grid = (grid0,)
        in_specs = [
            pl.BlockSpec((tm, K), lambda i: (i, 0)),
            pl.BlockSpec((K, n_pad), lambda i: (0, 0)),      # constant -> DMA'd once
            pl.BlockSpec((1, n_pad), lambda i: (0, 0)),
            pl.BlockSpec((1, n_pad), lambda i: (0, 0)),
        ]
        if activation == "SimNorm":
            in_specs.append(pl.BlockSpec((n_pad, n_pad), lambda i: (0, 0)))
        out_spec = pl.BlockSpec((tm, n_pad), lambda i: (i, 0))
        scratch = []
        dims = ("parallel",)
    else:
        grid = (grid0, k_pad // tk)
        in_specs = [
            pl.BlockSpec((tm, tk), lambda i, k: (i, k)),
            pl.BlockSpec((tk, n_pad), lambda i, k: (k, 0)),
            pl.BlockSpec((1, n_pad), lambda i, k: (0, 0)),
            pl.BlockSpec((1, n_pad), lambda i, k: (0, 0)),
        ]
        if activation == "SimNorm":
            in_specs.append(pl.BlockSpec((n_pad, n_pad), lambda i, k: (0, 0)))
        out_spec = pl.BlockSpec((tm, n_pad), lambda i, k: (i, 0))
        scratch = [pltpu.VMEM((tm, n_pad), jnp.float32)]
        dims = ("parallel", "arbitrary")

    kernel = functools.partial(_normed_linear_kernel,
                               activation=activation, simnorm_dim=simnorm_dim,
                               eps=eps, out_features=N, n_pad=n_pad,
                               mxu_dtype=mxu_dtype, k_tiled=k_tiled)

    out = pl.pallas_call(
        kernel,
        out_shape=jax.ShapeDtypeStruct((rows_pad, n_pad), out_dtype),
        grid_spec=pltpu.PrefetchScalarGridSpec(
            num_scalar_prefetch=0,
            grid=grid,
            in_specs=in_specs,
            out_specs=out_spec,
            scratch_shapes=scratch,
        ),
        compiler_params=pltpu.CompilerParams(
            dimension_semantics=dims,
            vmem_limit_bytes=vmem_limit,
        ),
    )(*operands)

    out = out[:rows, :N]
    return out.reshape(*orig_shape[:-1], N)


def _reference(x, weight, gamma, beta, *, activation, simnorm_dim=8, eps=1e-5,
               mxu_dtype=jnp.bfloat16):
    """Pure-JAX reference (same bf16 matmul inputs, f32 accumulation/epilogue)."""
    y = jnp.dot(x.astype(mxu_dtype), weight.T.astype(mxu_dtype),
                preferred_element_type=jnp.float32)
    mean = jnp.mean(y, axis=-1, keepdims=True)
    var = jnp.mean(jnp.square(y - mean), axis=-1, keepdims=True)
    y = (y - mean) * jax.lax.rsqrt(var + eps) * gamma + beta
    if activation == "Mish":
        y = y * jnp.tanh(jax.nn.softplus(y))
    else:
        shape = y.shape
        g = y.reshape(*shape[:-1], -1, simnorm_dim)
        y = jax.nn.softmax(g, axis=-1).reshape(shape)
    return y


if __name__ == "__main__":
    # Small shapes: batch=2, seq=4, in_features=32, out_features=32.
    batch, seq = 2, 4
    in_features, out_features = 32, 32

    key = jax.random.PRNGKey(0)
    kx, kw = jax.random.split(key)

    x = jax.random.normal(kx, (batch, seq, in_features), dtype=jnp.float32)

    # Deterministic parameter init (PyTorch-like: W ~ U(-1/sqrt(in), 1/sqrt(in)),
    # LayerNorm gamma=1, beta=0; Linear bias=False by module default).
    bound = 1.0 / (in_features ** 0.5)
    weight = jax.random.uniform(kw, (out_features, in_features),
                                minval=-bound, maxval=bound, dtype=jnp.float32)
    gamma = jnp.ones((out_features,), dtype=jnp.float32)
    beta = jnp.zeros((out_features,), dtype=jnp.float32)

    out_mish = normed_linear(x, weight, gamma, beta, activation="Mish")
    out_simnorm = normed_linear(x, weight, gamma, beta, activation="SimNorm",
                                simnorm_dim=8)
    jax.block_until_ready((out_mish, out_simnorm))

    assert out_mish.shape == (batch, seq, out_features)
    assert out_simnorm.shape == (batch, seq, out_features)

    ref_mish = _reference(x, weight, gamma, beta, activation="Mish")
    ref_sim = _reference(x, weight, gamma, beta, activation="SimNorm", simnorm_dim=8)
    assert jnp.allclose(out_mish, ref_mish, atol=1e-2, rtol=1e-2)
    assert jnp.allclose(out_simnorm, ref_sim, atol=1e-2, rtol=1e-2)

    print("KERNEL_OK")
</pallas_src>

<mosaic_0001>
module attributes {stable_mosaic.version = 11 : i64} {
  func.func @_normed_linear_kernel(%arg0: i32, %arg1: memref<8x32xf32, #tpu.memory_space<vmem>>, %arg2: memref<32x128xbf16, #tpu.memory_space<vmem>>, %arg3: memref<1x128xf32, #tpu.memory_space<vmem>>, %arg4: memref<1x128xf32, #tpu.memory_space<vmem>>, %arg5: memref<8x128xf32, #tpu.memory_space<vmem>>) attributes {dimension_semantics = [#tpu.dimension_semantics<parallel>], iteration_bounds = array<i64: 1>, scalar_prefetch = 0 : i64, scratch_operands = 0 : i64, tpu.core_type = #tpu.core_type<tc>, window_params = [{transform_indices = @transform_0, window_bounds = array<i64: 8, 32>}, {pipeline_mode = #tpu.pipeline_mode<synchronous>, transform_indices = @transform_1, window_bounds = array<i64: 32, 128>}, {pipeline_mode = #tpu.pipeline_mode<synchronous>, transform_indices = @transform_2, window_bounds = array<i64: 1, 128>}, {pipeline_mode = #tpu.pipeline_mode<synchronous>, transform_indices = @transform_3, window_bounds = array<i64: 1, 128>}, {transform_indices = @transform_4, window_bounds = array<i64: 8, 128>}]} {
    %c0 = arith.constant 0 : index
    %c0_0 = arith.constant 0 : index
    %0 = vector.load %arg1[%c0, %c0_0] : memref<8x32xf32, #tpu.memory_space<vmem>>, vector<8x32xf32>
    %1 = arith.truncf %0 : vector<8x32xf32> to vector<8x32xbf16>
    %c0_1 = arith.constant 0 : index
    %c0_2 = arith.constant 0 : index
    %2 = vector.load %arg2[%c0_1, %c0_2] : memref<32x128xbf16, #tpu.memory_space<vmem>>, vector<32x128xbf16>
    %cst = arith.constant dense<0.000000e+00> : vector<8x128xf32>
    %3 = tpu.matmul %1, %2, %cst {dimension_numbers = #tpu.dot_dimension_numbers<[1], [0], [0], [1], [0, 0, 1, 1], [], []>} : vector<8x32xbf16>, vector<32x128xbf16>, vector<8x128xf32> -> vector<8x128xf32>
    %cst_3 = arith.constant dense<0.000000e+00> : vector<8xf32>
    %4 = vector.multi_reduction <add>, %3, %cst_3 [1] : vector<8x128xf32> to vector<8xf32>
    %5 = vector.shape_cast %4 : vector<8xf32> to vector<8x1xf32>
    %cst_4 = arith.constant 3.125000e-02 : f32
    %6 = vector.broadcast %cst_4 : f32 to vector<8x1xf32>
    %7 = arith.mulf %5, %6 : vector<8x1xf32>
    %8 = vector.broadcast %7 : vector<8x1xf32> to vector<8x128xf32>
    %9 = arith.subf %3, %8 : vector<8x128xf32>
    %10 = tpu.iota {dimensions = array<i32: 1>} : vector<8x128xi32>
    %c32_i32 = arith.constant 32 : i32
    %11 = vector.broadcast %c32_i32 : i32 to vector<8x128xi32>
    %12 = arith.cmpi slt, %10, %11 : vector<8x128xi32>
    %cst_5 = arith.constant 0.000000e+00 : f32
    %13 = vector.broadcast %cst_5 : f32 to vector<8x128xf32>
    %14 = arith.select %12, %9, %13 : vector<8x128xi1>, vector<8x128xf32>
    %15 = arith.mulf %14, %14 : vector<8x128xf32>
    %cst_6 = arith.constant dense<0.000000e+00> : vector<8xf32>
    %16 = vector.multi_reduction <add>, %15, %cst_6 [1] : vector<8x128xf32> to vector<8xf32>
    %17 = vector.shape_cast %16 : vector<8xf32> to vector<8x1xf32>
    %cst_7 = arith.constant 3.125000e-02 : f32
    %18 = vector.broadcast %cst_7 : f32 to vector<8x1xf32>
    %19 = arith.mulf %17, %18 : vector<8x1xf32>
    %cst_8 = arith.constant 9.99999974E-6 : f32
    %20 = vector.broadcast %cst_8 : f32 to vector<8x1xf32>
    %21 = arith.addf %19, %20 : vector<8x1xf32>
    %22 = math.rsqrt %21 : vector<8x1xf32>
    %23 = vector.broadcast %22 : vector<8x1xf32> to vector<8x128xf32>
    %24 = arith.mulf %14, %23 : vector<8x128xf32>
    %c0_9 = arith.constant 0 : index
    %c0_10 = arith.constant 0 : index
    %25 = vector.load %arg3[%c0_9, %c0_10] : memref<1x128xf32, #tpu.memory_space<vmem>>, vector<1x128xf32>
    %26 = vector.broadcast %25 : vector<1x128xf32> to vector<8x128xf32>
    %27 = arith.mulf %24, %26 : vector<8x128xf32>
    %c0_11 = arith.constant 0 : index
    %c0_12 = arith.constant 0 : index
    %28 = vector.load %arg4[%c0_11, %c0_12] : memref<1x128xf32, #tpu.memory_space<vmem>>, vector<1x128xf32>
    %29 = vector.broadcast %28 : vector<1x128xf32> to vector<8x128xf32>
    %30 = arith.addf %27, %29 : vector<8x128xf32>
    %cst_13 = arith.constant 2.000000e+01 : f32
    %31 = vector.broadcast %cst_13 : f32 to vector<8x128xf32>
    %32 = arith.minimumf %30, %31 : vector<8x128xf32>
    %33 = math.exp %32 : vector<8x128xf32>
    %cst_14 = arith.constant 2.000000e+00 : f32
    %34 = vector.broadcast %cst_14 : f32 to vector<8x128xf32>
    %35 = arith.addf %33, %34 : vector<8x128xf32>
    %36 = arith.mulf %33, %35 : vector<8x128xf32>
    %37 = arith.mulf %30, %36 : vector<8x128xf32>
    %cst_15 = arith.constant 2.000000e+00 : f32
    %38 = vector.broadcast %cst_15 : f32 to vector<8x128xf32>
    %39 = arith.addf %36, %38 : vector<8x128xf32>
    %40 = tpu.reciprocal %39 {approx = true} : vector<8x128xf32> -> vector<8x128xf32>
    %41 = arith.mulf %37, %40 : vector<8x128xf32>
    %cst_16 = arith.constant 2.000000e+01 : f32
    %42 = vector.broadcast %cst_16 : f32 to vector<8x128xf32>
    %43 = arith.cmpf ogt, %30, %42 : vector<8x128xf32>
    %44 = arith.select %43, %30, %41 : vector<8x128xi1>, vector<8x128xf32>
    %c0_17 = arith.constant 0 : index
    %c0_18 = arith.constant 0 : index
    %45 = vector.load %arg5[%c0_17, %c0_18] : memref<8x128xf32, #tpu.memory_space<vmem>>, vector<8x128xf32>
    tpu.vector_store %arg5[%c0_17, %c0_18], %44 {strides = array<i32>} : memref<8x128xf32, #tpu.memory_space<vmem>>, vector<8x128xf32>,
    return
  }
  func.func @transform_0(%arg0: i32) -> (i32, i32) {
    %c0_i32 = arith.constant 0 : i32
    %c0_i32_0 = arith.constant 0 : i32
    return %arg0, %c0_i32 : i32, i32
  }
  func.func @transform_1(%arg0: i32) -> (i32, i32) {
    %c0_i32 = arith.constant 0 : i32
    %c0_i32_0 = arith.constant 0 : i32
    %c0_i32_1 = arith.constant 0 : i32
    return %c0_i32, %c0_i32_0 : i32, i32
  }
  func.func @transform_2(%arg0: i32) -> (i32, i32) {
    %c0_i32 = arith.constant 0 : i32
    %c0_i32_0 = arith.constant 0 : i32
    %c0_i32_1 = arith.constant 0 : i32
    return %c0_i32, %c0_i32_0 : i32, i32
  }
  func.func @transform_3(%arg0: i32) -> (i32, i32) {
    %c0_i32 = arith.constant 0 : i32
    %c0_i32_0 = arith.constant 0 : i32
    %c0_i32_1 = arith.constant 0 : i32
    return %c0_i32, %c0_i32_0 : i32, i32
  }
  func.func @transform_4(%arg0: i32) -> (i32, i32) {
    %c0_i32 = arith.constant 0 : i32
    %c0_i32_0 = arith.constant 0 : i32
    return %arg0, %c0_i32 : i32, i32
  }
}

</mosaic_0001>

<bundles_post_ra>
// kernel: tpu_custom_call.1
= control target key start
LH: loop header
LB: loop body
LE: loop exit
PB: predicated region body
PF: predicated region fallthrough
CT: control target
= control target key end

     0   :  { %9 = vsyncpa [#allocation3], 0  ;;  %s350_s0 = inlined_call_operand.hbm [shape: f32[8,32], index: 0, kind: input, shape index: {}]   ;;  %s351_s1 = inlined_call_operand.hbm [shape: bf16[32,128], index: 1, kind: input, shape index: {}]   ;;  %s352_s2 = inlined_call_operand.vmem [shape: f32[1,128], index: 2, kind: input, shape index: {}]   ;;  %s353_s3 = inlined_call_operand.vmem [shape: f32[1,128], index: 3, kind: input, shape index: {}]   ;;  %s354_s4 = inlined_call_operand.hbm [shape: f32[8,128], index: 4, kind: output, shape index: {}]  }
   0x1   :  { %10 = vsyncpa [#allocation6], 0 }
   0x2   :  { %11 = vsyncpa [#allocation4], 0  ;;  %s269_s15 = smov [#allocation2]   ;;  %s270_s17 = smov [#allocation5]  }
   0x3   :  { %s18_s16 = sshll.u32 %s269_s15, 4  ;;  %s27_s18 = sshll.u32 %s270_s17, 4  ;;  %s19_s16 = int_to_ptr.vmem [resolvable:$true] %s18_s16  ;;  %s301_s18 = int_to_ptr.vmem [resolvable:$true] %s27_s18 }
   0x4   :  { %s197_s21 = scalar_lea.hbm %s350_s0, 128 }
   0x5   :  { %p198_p0 = scmp.ne.s32.totalorder %s350_s0, %s197_s21  ;;  %p201_p1 = scmp.lt.u32.totalorder %s197_s21, %s350_s0 }
   0x7   :  { %p203_p2 = pnand %p201_p1, %p198_p0 }
   0x9   :  { %206 = shalt.err (!%p203_p2)
}
   0xa   :  { %s207_s26 = scalar_lea.vmem %s19_s16, 128  ;;  %p212_p4 = scmp.lt.s32.totalorder %s19_s16, %s19_s16 }
   0xb   :  { %p208_p3 = scmp.ne.s32.totalorder %s19_s16, %s207_s26  ;;  %p213_p5 = scmp.lt.s32.totalorder %s207_s26, %s207_s26 }
   0xd   :  { %p214_p6 = por %p213_p5, %p212_p4 }
   0xf   :  { %p215_p7 = pnand %p214_p6, %p208_p3 }
  0x11   :  { %218 = shalt.err (!%p215_p7)
}
  0x12   :  { %21 = dma.hbm_to_vmem [thread:$0]  %s350_s0, 128, %s19_s16, [#allocation3]  }
  0x13   :  { %s219_s5 = scalar_lea.hbm %s351_s1, 256 }
  0x14   :  { %p220_p8 = scmp.ne.s32.totalorder %s351_s1, %s219_s5  ;;  %p223_p9 = scmp.lt.u32.totalorder %s219_s5, %s351_s1 }
  0x16   :  { %p225_p10 = pnand %p223_p9, %p220_p8 }
  0x18   :  { %228 = shalt.err (!%p225_p10)
}
  0x19   :  { %s229_s10 = scalar_lea.vmem %s301_s18, 256  ;;  %p234_p12 = scmp.lt.s32.totalorder %s301_s18, %s301_s18 }
  0x1a   :  { %p230_p11 = scmp.ne.s32.totalorder %s301_s18, %s229_s10  ;;  %p235_p13 = scmp.lt.s32.totalorder %s229_s10, %s229_s10 }
  0x1c   :  { %p236_p0 = por %p235_p13, %p234_p12 }
  0x1e   :  { %p237_p1 = pnand %p236_p0, %p230_p11 }
  0x20   :  { %240 = shalt.err (!%p237_p1)
}
  0x21   :  { %s271_s0 = smov 64   ;;  %s272_s11 = smov 4  }
  0x22   :  { %33 = dma.hbm_to_vmem [thread:$0]  %s351_s1, 256, %s301_s18, [#allocation6], %s271_s0, %s271_s0, %s272_s11  }
  0x23   :  { %263 = dma.done.wait [#allocation3], 128  }
  0x24   :  { %264 = vsyncadd [#allocation3], 4294967168 }
  0x25   :  { %265 = dma.done.wait [#allocation6], 256  }
  0x26   :  { %266 = vsyncadd [#allocation6], 4294967040  ;;  %v273_v0 = vmov 0.0   ;;  %vm274_vm0 = vmmov 0   ;;  %v189_v1 = vld [vmem:[#allocation5] sm:$0xff]   ;;  %v190_v2 = vld [vmem:[#allocation5 + $0x8] sm:$0xff]   ;;  %v111_v9 = vlaneseq }
  0x27   :  { %174 = vmatprep.subr.bf16.mxu0 %v273_v0  ;;  %178 = vmatprep.mubr.msk.bf16.mxu0 %vm274_vm0, %v273_v0  ;;  %v45_v3 = vld [vmem:[#allocation2] sm:$0xff]  ;;  %vm63_vm1 = vcmask 261120   ;;  %s275_s17 = smov [#allocation7]  }
  0x28   :  { %175 = vmatpush3.bf16.msra.mxu0 %v189_v1  ;;  %v46_v4 = vpack.c.bf16 %v45_v3, %v45_v3  ;;  %v112_v10 = vand.u32 127, %v111_v9  ;;  %v169_v20 = vld [vmem:[%s352_s2] ss:$0 sm:$0xff]  ;;  %s156_s18 = sshll.u32 %s275_s17, 4  ;;  %s157_s18 = int_to_ptr.vmem [resolvable:$true] %s156_s18 }
  0x29   :  { %176 = vmatprep.subr.bf16.mxu0 %v273_v0  ;;  %v170_v22 = vld [vmem:[%s353_s3] ss:$0 sm:$0xff]  ;;  %s241_s2 = scalar_lea.vmem %s157_s18, 128  ;;  %p246_p3 = scmp.lt.s32.totalorder %s157_s18, %s157_s18 }
  0x2a   :  { %vm113_vm2 = vcmp.lt.s32.totalorder %v112_v10, 32  ;;  %p242_p2 = scmp.ne.s32.totalorder %s157_s18, %s241_s2  ;;  %p247_p4 = scmp.lt.s32.totalorder %s241_s2, %s241_s2 }
  0x2c   :  { %177 = vmatpush3.bf16.msra.mxu0 %v190_v2  ;;  %p248_p5 = por %p247_p4, %p246_p3 }
  0x2e   :  { %p249_p6 = pnand %p248_p5, %p242_p2 }
  0x2f   :  { %179 = vmatmul.mubr.msk.bf16.vlgmr.msra.gmra.mrb[0].mxu0 %vm63_vm1, %v46_v4 }
 0x102   :  { %v101_v5 = vpop.f32.mrb[0].mxu0 }
 0x103   :  { %107 = vadd.xlane.f32.xlu0 %v101_v5  ;;  %v180_v6 = vpop.f32.mrb[1].mxu0 }
 0x104   :  { %v104_v7 = vpop.f32.mrb[2].mxu0 }
 0x105   :  { %v181_v8 = vpop.f32.mrb[3].mxu0 }
 0x190   :  { %v108_v11 = vpop.xlane.xlu0 %107 }
 0x191   :  { %v109_v12 = vmul.f32 0.03125, %v108_v11 }
 0x193   :  { %v110_v13 = vsub.f32 %v101_v5, %v109_v12 }
 0x195   :  { %v114_v14 = vsel %vm113_vm2, %v110_v13, 0.0 }
 0x196   :  { %v115_v15 = vmul.f32 %v114_v14, %v114_v14 }
 0x198   :  { %116 = vadd.xlane.f32.xlu0 %v115_v15 }
 0x225   :  { %v117_v16 = vpop.xlane.xlu0 %116 }
 0x226   :  { %v118_v17 = vmul.f32 0.03125, %v117_v16 }
 0x228   :  { %v119_v18 = vadd.f32 1e-05, %v118_v17 }
 0x22a   :  { %191 = vrsqrt.f32 %v119_v18 }
 0x234   :  { %v192_v19 = vpop.eup %191 }
 0x235   :  { %v121_v21 = vmul.f32 %v192_v19, %v114_v14 }
 0x237   :  { %v129_v23 = vmul.f32 %v169_v20, %v121_v21 }
 0x239   :  { %v137_v24 = vadd.f32 %v170_v22, %v129_v23 }
 0x23b   :  { %v138_v25 = vmin.f32 %v137_v24, 20.0  ;;  %vm147_vm3 = vcmp.gt.f32.partialorder %v137_v24, 20.0 }
 0x23d   :  { %v139_v26 = vmul.f32 1.442695, %v138_v25 }
 0x23f   :  { %193 = vpow2.f32 %v139_v26 }
 0x249   :  { %v194_v27 = vpop.eup %193 }
 0x24a   :  { %v141_v28 = vadd.f32 2.0, %v194_v27 }
 0x24c   :  { %v142_v29 = vmul.f32 %v194_v27, %v141_v28 }
 0x24e   :  { %v144_v30 = vadd.f32 2.0, %v142_v29  ;;  %v143_v31 = vmul.f32 %v142_v29, %v137_v24 }
 0x250   :  { %195 = vrcp.f32 %v144_v30 }
 0x25a   :  { %v196_v32 = vpop.eup %195 }
 0x25b   :  { %v146_v33 = vmul.f32 %v196_v32, %v143_v31 }
 0x25d   :  { %v148_v34 = vsel %vm147_vm3, %v137_v24, %v146_v33 }
 0x25e   :  { %149 = vst [vmem:[#allocation7] sm:$0xff] %v148_v34 }
 0x25f   :  { %252 = shalt.err (!%p249_p6)
}
 0x260   :  { %s253_s20 = scalar_lea.hbm %s354_s4, 128 }
 0x261   :  { %p254_p7 = scmp.ne.s32.totalorder %s354_s4, %s253_s20  ;;  %p257_p8 = scmp.lt.u32.totalorder %s253_s20, %s354_s4 }
 0x263   :  { %p259_p9 = pnand %p257_p8, %p254_p7 }
 0x265   :  { %262 = shalt.err (!%p259_p9)
}
 0x266   :  { %159 = dma.vmem_to_hbm [thread:$0]  %s157_s18, 128, %s354_s4, [#allocation4]  }
 0x267   :  { %267 = dma.done.wait [#allocation4], 128  }
 0x268   :  { %268 = vsyncadd [#allocation4], 4294967168 }
 0x269   :  { %163 = vsyncpa [#allocation3], 1 }
 0x26a   :  { %164 = vsyncpa [#allocation6], 1 }
 0x26b   :  { %165 = vsyncpa [#allocation4], 1 }

</bundles_post_ra>
